<compile_context>
chip_gen: v6e
topology: v6e:2x2x1
jax: 0.10.0
libtpu: 0.0.40
codegen_flags: <defaults>
</compile_context>

<pallas_src>
import functools

import jax
import jax.numpy as jnp
from jax.experimental import pallas as pl
from jax.experimental.pallas import tpu as pltpu


def _global_pool_kernel(x_ref, out_ref, sum_ref, max_ref, *, inv_hw):
    """Process one (TM, TK) input tile.

    Grid: (row_tiles [parallel], col_tiles [arbitrary, reduction]).
    sum_ref/max_ref: (TM, 1) f32 running accumulators (VMEM scratch).
    out_ref: (TM, 2) block; col 0 = avg, col 1 = max, written on last col step.
    """
    k = pl.program_id(1)

    @pl.when(k == 0)
    def _init():
        sum_ref[...] = jnp.zeros(sum_ref.shape, jnp.float32)
        max_ref[...] = jnp.full(max_ref.shape, -jnp.inf, jnp.float32)

    # Accumulate in f32 regardless of input dtype (bf16-safe on v5e).
    x = x_ref[...].astype(jnp.float32)
    sum_ref[...] += jnp.sum(x, axis=-1, keepdims=True)
    max_ref[...] = jnp.maximum(max_ref[...], jnp.max(x, axis=-1, keepdims=True))

    @pl.when(k == pl.num_programs(1) - 1)
    def _finalize():
        avg = sum_ref[...] * inv_hw               # (TM, 1) f32
        mx = max_ref[...]                         # (TM, 1) f32
        out_ref[:, 0:1] = avg.astype(out_ref.dtype)
        out_ref[:, 1:2] = mx.astype(out_ref.dtype)


def global_pool(x, *, target_block_bytes=4 * 1024 * 1024):
    """x: (B, C, H, W) -> (B, 2C, 1, 1), [avg ; max] like torch.cat(dim=1)."""
    B, C, H, W = x.shape
    rows, cols = B * C, H * W
    x2d = x.reshape(rows, cols)
    itemsize = x2d.dtype.itemsize

    # ---- column (spatial) tiling: only when even a minimal 8-row, full-width
    # block exceeds the per-block budget AND cols is 128-divisible, so no
    # padded lanes can leak into the sum/max. Otherwise keep cols un-tiled
    # (full-dim block sidesteps the (8,128) divisibility constraint).
    if 8 * cols * itemsize > target_block_bytes and cols % 128 == 0:
        tk = max(128, (target_block_bytes // (8 * itemsize)) // 128 * 128)
        tk = min(tk, cols)
        while cols % tk != 0:   # tk must evenly divide cols (no padded col tile)
            tk -= 128
    else:
        tk = cols
    num_k = cols // tk

    # ---- row tiling: largest multiple of 8 under the budget, capped at 1024
    # (keeps scratch / output blocks small and fits all generations' VMEM).
    tm = (target_block_bytes // (tk * itemsize)) // 8 * 8
    tm = int(max(8, min(tm, 1024, ((rows + 7) // 8) * 8)))
    num_i = pl.cdiv(rows, tm)

    kernel = functools.partial(_global_pool_kernel, inv_hw=1.0 / float(cols))

    out2d = pl.pallas_call(
        kernel,
        out_shape=jax.ShapeDtypeStruct((rows, 2), x.dtype),
        grid=(num_i, num_k),
        in_specs=[pl.BlockSpec((tm, tk), lambda i, k: (i, k))],
        out_specs=pl.BlockSpec((tm, 2), lambda i, k: (i, 0)),
        scratch_shapes=[
            pltpu.VMEM((tm, 1), jnp.float32),   # running sum
            pltpu.VMEM((tm, 1), jnp.float32),   # running max
        ],
        compiler_params=pltpu.CompilerParams(
            dimension_semantics=("parallel", "arbitrary"),
            vmem_limit_bytes=32 * 1024 * 1024,
        ),
    )(x2d)

    avg_out = out2d[:, 0].reshape(B, C, 1, 1)
    max_out = out2d[:, 1].reshape(B, C, 1, 1)
    return jnp.concatenate([avg_out, max_out], axis=1)


if __name__ == "__main__":
    key = jax.random.PRNGKey(0)
    B, C, H, W = 2, 4, 16, 16
    x = jax.random.normal(key, (B, C, H, W), dtype=jnp.float32)

    out = jax.block_until_ready(global_pool(x))

    # sanity check against plain-JAX reference
    ref = jnp.concatenate(
        [
            jnp.mean(x, axis=(2, 3), keepdims=True),
            jnp.max(x, axis=(2, 3), keepdims=True),
        ],
        axis=1,
    )
    assert out.shape == (B, 2 * C, 1, 1), out.shape
    assert jnp.allclose(out, ref, atol=1e-5, rtol=1e-5)

    print("KERNEL_OK")
</pallas_src>

<mosaic_0001>
module attributes {stable_mosaic.version = 11 : i64} {
  func.func @_global_pool_kernel(%arg0: i32, %arg1: i32, %arg2: memref<8x256xf32, #tpu.memory_space<vmem>>, %arg3: memref<8x2xf32, #tpu.memory_space<vmem>>, %arg4: memref<8x1xf32, #tpu.memory_space<vmem>>, %arg5: memref<8x1xf32, #tpu.memory_space<vmem>>) attributes {dimension_semantics = [#tpu.dimension_semantics<parallel>, #tpu.dimension_semantics<arbitrary>], iteration_bounds = array<i64: 1, 1>, scalar_prefetch = 0 : i64, scratch_operands = 2 : i64, tpu.core_type = #tpu.core_type<tc>, window_params = [{transform_indices = @transform_0, window_bounds = array<i64: 8, 256>}, {transform_indices = @transform_1, window_bounds = array<i64: 8, 2>}]} {
    %c0_i32 = arith.constant 0 : i32
    %0 = arith.cmpi eq, %arg1, %c0_i32 : i32
    %1 = arith.extui %0 : i1 to i32
    %c0_i32_0 = arith.constant 0 : i32
    %2 = arith.cmpi ne, %1, %c0_i32_0 : i32
    scf.if %2 {
      %cst_13 = arith.constant 0.000000e+00 : f32
      %17 = vector.broadcast %cst_13 : f32 to vector<8x1xf32>
      %c0_14 = arith.constant 0 : index
      %c0_15 = arith.constant 0 : index
      %18 = vector.load %arg4[%c0_14, %c0_15] : memref<8x1xf32, #tpu.memory_space<vmem>>, vector<8x1xf32>
      tpu.vector_store %arg4[%c0_14, %c0_15], %17 {strides = array<i32>} : memref<8x1xf32, #tpu.memory_space<vmem>>, vector<8x1xf32>,
      %cst_16 = arith.constant 0xFF800000 : f32
      %19 = vector.broadcast %cst_16 : f32 to vector<8x1xf32>
      %c0_17 = arith.constant 0 : index
      %c0_18 = arith.constant 0 : index
      %20 = vector.load %arg5[%c0_17, %c0_18] : memref<8x1xf32, #tpu.memory_space<vmem>>, vector<8x1xf32>
      tpu.vector_store %arg5[%c0_17, %c0_18], %19 {strides = array<i32>} : memref<8x1xf32, #tpu.memory_space<vmem>>, vector<8x1xf32>,
    } else {
    }
    %c0 = arith.constant 0 : index
    %c0_1 = arith.constant 0 : index
    %3 = vector.load %arg2[%c0, %c0_1] : memref<8x256xf32, #tpu.memory_space<vmem>>, vector<8x256xf32>
    %c0_2 = arith.constant 0 : index
    %c0_3 = arith.constant 0 : index
    %4 = vector.load %arg4[%c0_2, %c0_3] : memref<8x1xf32, #tpu.memory_space<vmem>>, vector<8x1xf32>
    %cst = arith.constant dense<0.000000e+00> : vector<8xf32>
    %5 = vector.multi_reduction <add>, %3, %cst [1] : vector<8x256xf32> to vector<8xf32>
    %6 = vector.shape_cast %5 : vector<8xf32> to vector<8x1xf32>
    %7 = arith.addf %4, %6 : vector<8x1xf32>
    %c0_4 = arith.constant 0 : index
    %c0_5 = arith.constant 0 : index
    %8 = vector.load %arg4[%c0_4, %c0_5] : memref<8x1xf32, #tpu.memory_space<vmem>>, vector<8x1xf32>
    tpu.vector_store %arg4[%c0_4, %c0_5], %7 {strides = array<i32>} : memref<8x1xf32, #tpu.memory_space<vmem>>, vector<8x1xf32>,
    %c0_6 = arith.constant 0 : index
    %c0_7 = arith.constant 0 : index
    %9 = vector.load %arg5[%c0_6, %c0_7] : memref<8x1xf32, #tpu.memory_space<vmem>>, vector<8x1xf32>
    %cst_8 = arith.constant dense<0xFF800000> : vector<8xf32>
    %10 = vector.multi_reduction <maximumf>, %3, %cst_8 [1] : vector<8x256xf32> to vector<8xf32>
    %11 = vector.shape_cast %10 : vector<8xf32> to vector<8x1xf32>
    %12 = arith.maximumf %9, %11 : vector<8x1xf32>
    %c0_9 = arith.constant 0 : index
    %c0_10 = arith.constant 0 : index
    %13 = vector.load %arg5[%c0_9, %c0_10] : memref<8x1xf32, #tpu.memory_space<vmem>>, vector<8x1xf32>
    tpu.vector_store %arg5[%c0_9, %c0_10], %12 {strides = array<i32>} : memref<8x1xf32, #tpu.memory_space<vmem>>, vector<8x1xf32>,
    %c0_i32_11 = arith.constant 0 : i32
    %14 = arith.cmpi eq, %arg1, %c0_i32_11 : i32
    %15 = arith.extui %14 : i1 to i32
    %c0_i32_12 = arith.constant 0 : i32
    %16 = arith.cmpi ne, %15, %c0_i32_12 : i32
    scf.if %16 {
      %c0_13 = arith.constant 0 : index
      %c0_14 = arith.constant 0 : index
      %17 = vector.load %arg4[%c0_13, %c0_14] : memref<8x1xf32, #tpu.memory_space<vmem>>, vector<8x1xf32>
      %cst_15 = arith.constant 3.906250e-03 : f32
      %18 = vector.broadcast %cst_15 : f32 to vector<8x1xf32>
      %19 = arith.mulf %17, %18 : vector<8x1xf32>
      %c0_16 = arith.constant 0 : index
      %c0_17 = arith.constant 0 : index
      %20 = vector.load %arg5[%c0_16, %c0_17] : memref<8x1xf32, #tpu.memory_space<vmem>>, vector<8x1xf32>
      %c0_18 = arith.constant 0 : index
      %c0_19 = arith.constant 0 : index
      %21 = vector.load %arg3[%c0_18, %c0_19] : memref<8x2xf32, #tpu.memory_space<vmem>>, vector<8x1xf32>
      tpu.vector_store %arg3[%c0_18, %c0_19], %19 {strides = array<i32>} : memref<8x2xf32, #tpu.memory_space<vmem>>, vector<8x1xf32>,
      %c0_20 = arith.constant 0 : index
      %c1 = arith.constant 1 : index
      %22 = vector.load %arg3[%c0_20, %c1] : memref<8x2xf32, #tpu.memory_space<vmem>>, vector<8x1xf32>
      tpu.vector_store %arg3[%c0_20, %c1], %20 {strides = array<i32>} : memref<8x2xf32, #tpu.memory_space<vmem>>, vector<8x1xf32>,
    } else {
    }
    return
  }
  func.func @transform_0(%arg0: i32, %arg1: i32) -> (i32, i32) {
    %c0_i32 = arith.constant 0 : i32
    return %arg0, %arg1 : i32, i32
  }
  func.func @transform_1(%arg0: i32, %arg1: i32) -> (i32, i32) {
    %c0_i32 = arith.constant 0 : i32
    %c0_i32_0 = arith.constant 0 : i32
    return %arg0, %c0_i32 : i32, i32
  }
}

</mosaic_0001>

<bundles_post_ra>
// kernel: tpu_custom_call.1
= control target key start
LH: loop header
LB: loop body
LE: loop exit
PB: predicated region body
PF: predicated region fallthrough
CT: control target
= control target key end

     0   :  { %6 = vsyncpa [#allocation5], 0  ;;  %s86_s6 = smov [#allocation4]   ;;  %s114_s0 = inlined_call_operand.hbm [shape: f32[8,256], index: 0, kind: input, shape index: {}]   ;;  %s115_s1 = inlined_call_operand.vmem [shape: f32[8,2], index: 1, kind: output, shape index: {}]  }
   0x1   :  { %s13_s7 = sshll.u32 %s86_s6, 4  ;;  %s14_s7 = int_to_ptr.vmem [resolvable:$true] %s13_s7 }
   0x2   :  { %s72_s8 = scalar_lea.vmem %s14_s7, 256  ;;  %p77_p1 = scmp.lt.s32.totalorder %s14_s7, %s14_s7 }
   0x3   :  { %p73_p0 = scmp.ne.s32.totalorder %s14_s7, %s72_s8  ;;  %p78_p2 = scmp.lt.s32.totalorder %s72_s8, %s72_s8 }
   0x5   :  { %p79_p3 = por %p78_p2, %p77_p1 }
   0x7   :  { %p80_p4 = pnand %p79_p3, %p73_p0 }
   0x9   :  { %83 = shalt.err (!%p80_p4)
}
   0xa   :  { %16 = dma.hbm_to_vmem [thread:$0]  %s114_s0, 256, %s14_s7, [#allocation5]  }
   0xb   :  { %84 = dma.done.wait [#allocation5], 256  }
   0xc   :  { %85 = vsyncadd [#allocation5], 4294967040  ;;  %vm24_vm0 = vcmask 7168   ;;  %v87_v0 = vmov -inf   ;;  %v27_v1 = vld [vmem:[#allocation4] sm:$0xff]  ;;  %v28_v2 = vld [vmem:[#allocation4 + $0x8] sm:$0xff] }
   0xd   :  { %26 = vst.msk [vmem:[#allocation3] sm:$0xff] %vm24_vm0, %v87_v0  ;;  %v37_v3 = vmax.f32 %v27_v1, %v28_v2  ;;  %v30_v4 = vadd.f32 %v28_v2, %v27_v1  ;;  %v88_v5 = vmov 0.0   ;;  %s89_s0 = smov 1   ;;  %vm53_vm1 = vcmask 15368  }
   0xe   :  { %25 = vst.msk [vmem:[#allocation2] sm:$0xff] %vm24_vm0, %v88_v5 }
   0xf   :  { %38 = vmax.xlane.f32.xlu0 %v37_v3 }
  0x13   :  { %31 = vadd.xlane.f32.xlu0 %v30_v4 }
  0x14   :  { %v36_v6 = vld [vmem:[#allocation3] sm:$0xff] }
  0x15   :  { %v29_v9 = vld [vmem:[#allocation2] sm:$0xff] }
  0x98   :  { %v39_v7 = vpop.xlane.xlu0 %38 }
  0x99   :  { %v40_v8 = vmax.f32 %v36_v6, %v39_v7 }
  0x9b   :  { %41 = vst.msk [vmem:[#allocation3] sm:$0xff] %vm24_vm0, %v40_v8 }
  0x9c   :  { %v32_v10 = vpop.xlane.xlu0 %31 }
  0x9d   :  { %v33_v11 = vadd.f32 %v32_v10, %v29_v9 }
  0x9f   :  { %35 = vst.msk [vmem:[#allocation2] sm:$0xff] %vm24_vm0, %v33_v11 }
  0xa2   :  { %v47_v12 = vld [vmem:[#allocation3] sm:$0xff] }
  0xa3   :  { %50 = vrot.lane.b32.xlu1 %v47_v12, %s89_s0 }
  0xa6   :  { %v45_v13 = vld [vmem:[#allocation2] sm:$0xff] }
  0xa7   :  { %v46_v14 = vmul.f32 0.00390625, %v45_v13 }
  0xa9   :  { %48 = vst.msk [vmem:[%s115_s1] sm:$0xff] %vm24_vm0, %v46_v14 }
 0x115   :  { %v51_v15 = vpop.permute.xlu1 %50 }
 0x116   :  { %54 = vst.msk [vmem:[%s115_s1] sm:$0xff] %vm53_vm1, %v51_v15 }
 0x117   :  { %59 = vsyncpa [#allocation5], 1 }

</bundles_post_ra>
